<compile_context>
chip_gen: v7x
topology: tpu7x:2x2x1
jax: 0.10.0
libtpu: 0.0.40
codegen_flags: <defaults>
</compile_context>

<pallas_src>
import functools

import jax
import jax.numpy as jnp
from jax.experimental import pallas as pl
from jax.experimental.pallas import tpu as pltpu

NEG = -1e9          # "minus infinity" fill for padded class columns / rows
TB_CAP = 1024       # max rows per B tile (raised so nb == 1 when VMEM allows)


def _round_up(x, m):
    return (x + m - 1) // m * m


def _pad_2d(a, rows, cols, fill):
    if a.shape == (rows, cols):
        return a                              # already padded -> no host copy
    out = jnp.full((rows, cols), fill, dtype=a.dtype)
    return out.at[:a.shape[0], :a.shape[1]].set(a)


def _hw():
    """(vmem capacity, usable budget, max K tile) for the local TPU generation."""
    try:
        cap = int(pltpu.get_tpu_info().vmem_capacity_bytes)
    except Exception:
        cap = 64 * 2**20                      # conservative fallback (v7x-sized)
    budget = min(int(cap * 0.6), 96 * 2**20)  # ~38 MiB on v7x, ~77-96 on v5e/v6e
    tk_cap = 1024 if cap <= 64 * 2**20 else 2048
    return cap, budget, tk_cap


def _vmem_need(tb, tk, c_pad, x_isz, w_isz, s_isz, kd_isz):
    return (2 * tb * tk * x_isz               # x block (double buffered)
            + 2 * tk * c_pad * w_isz          # teacher W block
            + 2 * tb * c_pad * s_isz          # student class logits
            + 2 * tb * c_pad * kd_isz         # student dist logits
            + 2 * tb * 128 * 4                # labels (lane-padded int32)
            + 2 * 8 * c_pad * 4               # bias
            + 2 * 8 * 128 * 4                 # partial-loss output block
            + tb * c_pad * 4                  # f32 accumulator scratch
            + 8 * tb * c_pad * 4)             # epilogue full-tile f32 temporaries


def _teacher_tiles(D, C, x_isz, w_isz):
    """Choose (c_pad, tk, d_pad) from shapes/dtypes + hardware only (no batch),
    so the constant teacher W / b can be padded once at init and reused."""
    _, budget, tk_cap = _hw()
    c_pad = _round_up(C, 128)
    d128 = _round_up(D, 128)
    nblk = d128 // 128
    # Prefer a tk that divides the 128-aligned D (no tail padding of x / W).
    tk = 128
    for g in range(min(nblk, tk_cap // 128), 0, -1):
        if nblk % g == 0 and _vmem_need(TB_CAP, 128 * g, c_pad,
                                        x_isz, w_isz, 4, 4) <= budget:
            tk = 128 * g
            break
    d_pad = _round_up(D, tk)
    return c_pad, tk, d_pad


def _batch_tiles(B, tk, c_pad, x_isz, w_isz, s_isz, kd_isz):
    _, budget, _ = _hw()
    row_pack = 8 * max(1, 4 // x_isz)         # f32: 8, bf16: 16, int8/fp8: 32
    tb = min(_round_up(B, row_pack), TB_CAP)
    while tb > row_pack and _vmem_need(tb, tk, c_pad, x_isz, w_isz,
                                       s_isz, kd_isz) > budget:
        tb = _round_up(tb // 2, row_pack)
    b_pad = _round_up(B, tb)
    return tb, b_pad


def pad_teacher_params(teacher_w, teacher_b, *, x_dtype=jnp.bfloat16):
    """Pad the (constant) teacher Linear parameters once at init so the loss
    call never re-pads / re-copies the largest array through HBM per step."""
    D, C = teacher_w.shape
    c_pad, _, d_pad = _teacher_tiles(D, C, jnp.dtype(x_dtype).itemsize,
                                     teacher_w.dtype.itemsize)
    w_p = _pad_2d(teacher_w, d_pad, c_pad, 0)
    b_p = _pad_2d(jnp.asarray(teacher_b).reshape(1, -1), 1, c_pad, NEG)
    return w_p, b_p


# --------------------------------------------------------------------------
# Kernels
# --------------------------------------------------------------------------
def _ce_rows_f32(lbl, logits, lane):
    """Per-row -log_softmax(logits)[r, lbl[r]] as (rows, 1); fully vectorized.
    `lbl` is (rows, 1) int32 (-1 => never matches a lane => picked = 0)."""
    m = jnp.max(logits, axis=1, keepdims=True)
    lse = m + jnp.log(jnp.sum(jnp.exp(logits - m), axis=1, keepdims=True))
    picked = jnp.sum(jnp.where(lane == lbl, logits, 0.0), axis=1, keepdims=True)
    return lse - picked


def _base_ce_kernel(lbl_ref, s_ref, out_ref, *, n_valid):
    """'none' path: plain cross-entropy, no teacher inputs DMA'd at all."""
    i = pl.program_id(0)
    tb, c_pad = s_ref.shape
    rows = jax.lax.broadcasted_iota(jnp.int32, (tb, 1), 0) + i * tb
    valid = (rows < n_valid).astype(jnp.float32)
    lane = jax.lax.broadcasted_iota(jnp.int32, (tb, c_pad), 1)
    ce = _ce_rows_f32(lbl_ref[...], s_ref[...].astype(jnp.float32), lane)
    base_partial = jnp.sum(ce * valid)
    sub = jax.lax.broadcasted_iota(jnp.int32, (1, 8, 128), 1)
    out_ref[...] = jnp.where(sub == 0, base_partial, 0.0)


def _distill_kernel(lbl_ref, x_ref, w_ref, b_ref, s_ref, kd_ref, out_ref,
                    acc_ref, *, tau, distillation_type, n_valid):
    i = pl.program_id(0)
    k = pl.program_id(1)
    nk = pl.num_programs(1)
    tb, c_pad = acc_ref.shape

    @pl.when(k == 0)
    def _init():
        # Seed the accumulator with the broadcast teacher bias: saves a full
        # tile add in the epilogue.  Padded class columns carry NEG, so they
        # vanish in softmax and never win the argmax.
        acc_ref[...] = jnp.broadcast_to(b_ref[...].astype(jnp.float32),
                                        (tb, c_pad))

    # K-tiled teacher matmul; native-dtype operands, f32 MXU accumulation.
    acc_ref[...] += jnp.dot(x_ref[...], w_ref[...],
                            preferred_element_type=jnp.float32)

    @pl.when(k == nk - 1)
    def _epilogue():
        rows = jax.lax.broadcasted_iota(jnp.int32, (tb, 1), 0) + i * tb
        valid = (rows < n_valid).astype(jnp.float32)
        lane = jax.lax.broadcasted_iota(jnp.int32, (tb, c_pad), 1)

        # ---- base criterion: CE(student class logits, labels) ----
        ce = _ce_rows_f32(lbl_ref[...], s_ref[...].astype(jnp.float32), lane)
        base_partial = jnp.sum(ce * valid)

        teacher = acc_ref[...]                          # bias already included
        kd = kd_ref[...].astype(jnp.float32)

        if distillation_type == 'soft':
            inv_t = jnp.float32(1.0 / tau)
            zt = teacher * inv_t
            mt = jnp.max(zt, axis=1, keepdims=True)
            et = jnp.exp(zt - mt)
            st = jnp.sum(et, axis=1, keepdims=True)

            zs = kd * inv_t
            ms = jnp.max(zs, axis=1, keepdims=True)
            ss = jnp.sum(jnp.exp(zs - ms), axis=1, keepdims=True)

            # sum_j p_t*(log_t - log_s) == [sum_j e_t*(log_t - log_s)] / s_t
            diff = (zt - mt - jnp.log(st)) - (zs - ms - jnp.log(ss))
            kl_rows = (jnp.sum(et * diff, axis=1, keepdims=True)
                       * pl.reciprocal(st, approx=True))
            dist_partial = jnp.sum(kl_rows * valid)
        else:  # 'hard': CE(student kd logits, argmax(teacher))
            tmax = jnp.max(teacher, axis=1, keepdims=True)
            t_arg = jnp.min(jnp.where(teacher == tmax, lane, c_pad),
                            axis=1, keepdims=True)      # first-index tie-break
            ce_kd = _ce_rows_f32(t_arg, kd, lane)
            dist_partial = jnp.sum(ce_kd * valid)

        # Lane-dense partial tile: sublane 0 = base CE sum, 1 = distill sum.
        sub = jax.lax.broadcasted_iota(jnp.int32, (1, 8, 128), 1)
        out_ref[...] = jnp.where(sub == 0, base_partial,
                                 jnp.where(sub == 1, dist_partial, 0.0))


# --------------------------------------------------------------------------
# Wrapper
# --------------------------------------------------------------------------
def distillation_loss(inputs, outputs, labels, teacher_w, teacher_b, *,
                      alpha, tau, distillation_type='soft'):
    """inputs: (B, Cin, H, W); outputs: (logits, logits_kd) each (B, C);
    labels: (B,) int; teacher_w: (D, C) (optionally pre-padded with
    pad_teacher_params); teacher_b: (C,) or pre-padded (1, c_pad).
    Returns the scalar DeiT distillation loss."""
    assert distillation_type in ('none', 'soft', 'hard')
    if isinstance(outputs, (tuple, list)):
        out, out_kd = outputs
    else:
        out, out_kd = outputs, None

    B, C = out.shape
    labels = labels.astype(jnp.int32).reshape(B, 1)

    # -------- 'none' path: base CE only, never DMA x / W / b --------
    if distillation_type == 'none':
        c_pad = _round_up(C, 128)
        tb = min(_round_up(B, 8), TB_CAP)
        b_pad = _round_up(B, tb)
        nb = b_pad // tb
        labels_pad = _pad_2d(labels, b_pad, 1, -1)
        s_pad = _pad_2d(out, b_pad, c_pad, NEG)
        partials = pl.pallas_call(
            functools.partial(_base_ce_kernel, n_valid=B),
            out_shape=jax.ShapeDtypeStruct((nb, 8, 128), jnp.float32),
            grid=(nb,),
            in_specs=[pl.BlockSpec((tb, 1), lambda i: (i, 0)),
                      pl.BlockSpec((tb, c_pad), lambda i: (i, 0))],
            out_specs=pl.BlockSpec((1, 8, 128), lambda i: (i, 0, 0)),
            compiler_params=pltpu.CompilerParams(
                dimension_semantics=("parallel",)),
        )(labels_pad, s_pad)
        return jnp.sum(partials[:, 0, 0]) / B

    if out_kd is None:
        raise ValueError(
            "When knowledge distillation is enabled, the model is expected to "
            "return a Tuple[Tensor, Tensor] with the output of the class_token "
            "and the dist_token")

    # -------- soft / hard: K-tiled teacher matmul + loss epilogue --------
    x_flat = inputs.reshape(B, -1)              # keep native dtype (bf16 ok)
    D = x_flat.shape[1]
    x_isz = x_flat.dtype.itemsize
    w_isz = teacher_w.dtype.itemsize
    s_isz = out.dtype.itemsize
    kd_isz = out_kd.dtype.itemsize

    c_pad, tk, d_pad = _teacher_tiles(D, C, x_isz, w_isz)
    tb, b_pad = _batch_tiles(B, tk, c_pad, x_isz, w_isz, s_isz, kd_isz)
    nb, nk = b_pad // tb, d_pad // tk

    labels_pad = _pad_2d(labels, b_pad, 1, -1)
    x_pad = _pad_2d(x_flat, b_pad, d_pad, 0)
    w_pad = _pad_2d(teacher_w, d_pad, c_pad, 0)            # no-op if pre-padded
    bias_pad = _pad_2d(jnp.asarray(teacher_b).reshape(1, -1), 1, c_pad, NEG)
    s_pad = _pad_2d(out, b_pad, c_pad, NEG)
    kd_pad = _pad_2d(out_kd, b_pad, c_pad, NEG)

    cap, _, _ = _hw()
    need = _vmem_need(tb, tk, c_pad, x_isz, w_isz, s_isz, kd_isz)
    vmem_limit = int(min(cap - (16 << 20), max(need + (8 << 20), 32 << 20)))

    cost = pl.CostEstimate(
        flops=2 * b_pad * d_pad * c_pad,
        transcendentals=3 * b_pad * c_pad,
        bytes_accessed=int(x_pad.size * x_isz + w_pad.size * w_isz
                           + s_pad.size * s_isz + kd_pad.size * kd_isz
                           + bias_pad.size * bias_pad.dtype.itemsize
                           + b_pad * 4 + nb * 8 * 128 * 4))

    kernel = functools.partial(_distill_kernel, tau=float(tau),
                               distillation_type=distillation_type, n_valid=B)

    partials = pl.pallas_call(
        kernel,
        out_shape=jax.ShapeDtypeStruct((nb, 8, 128), jnp.float32),
        grid=(nb, nk),                                     # K innermost
        in_specs=[
            pl.BlockSpec((tb, 1), lambda i, k: (i, 0)),        # labels (int32)
            pl.BlockSpec((tb, tk), lambda i, k: (i, k)),       # x
            pl.BlockSpec((tk, c_pad), lambda i, k: (k, 0)),    # teacher W
            pl.BlockSpec((1, c_pad), lambda i, k: (0, 0)),     # teacher bias
            pl.BlockSpec((tb, c_pad), lambda i, k: (i, 0)),    # student logits
            pl.BlockSpec((tb, c_pad), lambda i, k: (i, 0)),    # student kd logits
        ],
        out_specs=pl.BlockSpec((1, 8, 128), lambda i, k: (i, 0, 0)),
        scratch_shapes=[pltpu.VMEM((tb, c_pad), jnp.float32)],
        compiler_params=pltpu.CompilerParams(
            # nb == 1 in the common case, so W streams from HBM exactly once;
            # the B axis only shards across cores when B exceeds one VMEM tile.
            dimension_semantics=("parallel", "arbitrary"),
            vmem_limit_bytes=vmem_limit),
        cost_estimate=cost,
    )(labels_pad, x_pad, w_pad, bias_pad, s_pad, kd_pad)

    base_loss = jnp.sum(partials[:, 0, 0]) / B
    dist_sum = jnp.sum(partials[:, 1, 0])
    if distillation_type == 'soft':
        dist_loss = dist_sum * (tau * tau) / (B * C)       # / outputs_kd.numel()
    else:
        dist_loss = dist_sum / B
    return base_loss * (1.0 - alpha) + dist_loss * alpha


if __name__ == "__main__":
    key = jax.random.PRNGKey(0)
    B, Cin, H, W = 2, 4, 16, 16
    num_classes = 32
    D = Cin * H * W
    alpha, tau = 0.5, 3.0

    k1, k2, k3, k4, k5 = jax.random.split(key, 5)
    inputs = jax.random.normal(k1, (B, Cin, H, W), jnp.float32).astype(jnp.bfloat16)
    outputs = jax.random.normal(k2, (B, num_classes), jnp.float32)
    outputs_kd = jax.random.normal(k3, (B, num_classes), jnp.float32)
    labels = jax.random.randint(k4, (B,), 0, num_classes, jnp.int32)

    # deterministic synthetic teacher (Linear D -> num_classes), bf16 weights
    teacher_w = (jax.random.normal(k5, (D, num_classes), jnp.float32)
                 * 0.02).astype(jnp.bfloat16)
    teacher_b = jnp.zeros((num_classes,), jnp.float32)

    # Pad the constant teacher parameters ONCE (hoisted out of the loss call).
    teacher_w_p, teacher_b_p = pad_teacher_params(teacher_w, teacher_b,
                                                  x_dtype=inputs.dtype)

    def reference(distillation_type):
        x = inputs.reshape(B, -1).astype(jnp.float32)
        w = teacher_w.astype(jnp.float32)
        teacher = x @ w + teacher_b[None, :]
        log_p = jax.nn.log_softmax(outputs, axis=1)
        base = -jnp.mean(log_p[jnp.arange(B), labels])
        if distillation_type == 'none':
            return base
        if distillation_type == 'soft':
            T = tau
            log_s = jax.nn.log_softmax(outputs_kd / T, axis=1)
            log_t = jax.nn.log_softmax(teacher / T, axis=1)
            kl = jnp.sum(jnp.exp(log_t) * (log_t - log_s))
            dist = kl * (T * T) / outputs_kd.size
        else:
            t_lbl = jnp.argmax(teacher, axis=1)
            log_s = jax.nn.log_softmax(outputs_kd, axis=1)
            dist = -jnp.mean(log_s[jnp.arange(B), t_lbl])
        return base * (1 - alpha) + dist * alpha

    for dt in ('soft', 'hard', 'none'):
        got = distillation_loss(inputs, (outputs, outputs_kd), labels,
                                teacher_w_p, teacher_b_p,
                                alpha=alpha, tau=tau, distillation_type=dt)
        got = jax.block_until_ready(got)
        ref = reference(dt)
        assert jnp.allclose(got, ref, rtol=3e-4, atol=3e-4), (dt, got, ref)

    print("KERNEL_OK")
</pallas_src>

<mosaic_0001>
module attributes {stable_mosaic.version = 11 : i64} {
  func.func @_distill_kernel(%arg0: i32, %arg1: i32, %arg2: memref<16x1xi32, #tpu.memory_space<vmem>>, %arg3: memref<16x1024xbf16, #tpu.memory_space<vmem>>, %arg4: memref<1024x128xbf16, #tpu.memory_space<vmem>>, %arg5: memref<1x128xf32, #tpu.memory_space<vmem>>, %arg6: memref<16x128xf32, #tpu.memory_space<vmem>>, %arg7: memref<16x128xf32, #tpu.memory_space<vmem>>, %arg8: memref<1x8x128xf32, #tpu.memory_space<vmem>>, %arg9: memref<16x128xf32, #tpu.memory_space<vmem>>) attributes {dimension_semantics = [#tpu.dimension_semantics<parallel>, #tpu.dimension_semantics<arbitrary>], iteration_bounds = array<i64: 1, 1>, scalar_prefetch = 0 : i64, scratch_operands = 1 : i64, tpu.core_type = #tpu.core_type<tc>, window_params = [{transform_indices = @transform_0, window_bounds = array<i64: 16, 1>}, {transform_indices = @transform_1, window_bounds = array<i64: 16, 1024>}, {transform_indices = @transform_2, window_bounds = array<i64: 1024, 128>}, {pipeline_mode = #tpu.pipeline_mode<synchronous>, transform_indices = @transform_3, window_bounds = array<i64: 1, 128>}, {transform_indices = @transform_4, window_bounds = array<i64: 16, 128>}, {transform_indices = @transform_5, window_bounds = array<i64: 16, 128>}, {transform_indices = @transform_6, window_bounds = array<i64: 1, 8, 128>}]} {
    %c0_i32 = arith.constant 0 : i32
    %0 = arith.cmpi eq, %arg1, %c0_i32 : i32
    %1 = arith.extui %0 : i1 to i32
    %c0_i32_0 = arith.constant 0 : i32
    %2 = arith.cmpi ne, %1, %c0_i32_0 : i32
    scf.if %2 {
      %c0_10 = arith.constant 0 : index
      %c0_11 = arith.constant 0 : index
      %12 = vector.load %arg5[%c0_10, %c0_11] : memref<1x128xf32, #tpu.memory_space<vmem>>, vector<1x128xf32>
      %13 = vector.shape_cast %12 : vector<1x128xf32> to vector<1x128xf32>
      %14 = vector.broadcast %13 : vector<1x128xf32> to vector<16x128xf32>
      %c0_12 = arith.constant 0 : index
      %c0_13 = arith.constant 0 : index
      %15 = vector.load %arg9[%c0_12, %c0_13] : memref<16x128xf32, #tpu.memory_space<vmem>>, vector<16x128xf32>
      tpu.vector_store %arg9[%c0_12, %c0_13], %14 {strides = array<i32>} : memref<16x128xf32, #tpu.memory_space<vmem>>, vector<16x128xf32>,
    } else {
    }
    %c0 = arith.constant 0 : index
    %c0_1 = arith.constant 0 : index
    %3 = vector.load %arg9[%c0, %c0_1] : memref<16x128xf32, #tpu.memory_space<vmem>>, vector<16x128xf32>
    %c0_2 = arith.constant 0 : index
    %c0_3 = arith.constant 0 : index
    %4 = vector.load %arg3[%c0_2, %c0_3] : memref<16x1024xbf16, #tpu.memory_space<vmem>>, vector<16x1024xbf16>
    %c0_4 = arith.constant 0 : index
    %c0_5 = arith.constant 0 : index
    %5 = vector.load %arg4[%c0_4, %c0_5] : memref<1024x128xbf16, #tpu.memory_space<vmem>>, vector<1024x128xbf16>
    %cst = arith.constant dense<0.000000e+00> : vector<16x128xf32>
    %6 = tpu.matmul %4, %5, %cst {dimension_numbers = #tpu.dot_dimension_numbers<[1], [0], [0], [1], [0, 0, 1, 1], [], []>} : vector<16x1024xbf16>, vector<1024x128xbf16>, vector<16x128xf32> -> vector<16x128xf32>
    %7 = arith.addf %3, %6 : vector<16x128xf32>
    %c0_6 = arith.constant 0 : index
    %c0_7 = arith.constant 0 : index
    %8 = vector.load %arg9[%c0_6, %c0_7] : memref<16x128xf32, #tpu.memory_space<vmem>>, vector<16x128xf32>
    tpu.vector_store %arg9[%c0_6, %c0_7], %7 {strides = array<i32>} : memref<16x128xf32, #tpu.memory_space<vmem>>, vector<16x128xf32>,
    %c0_i32_8 = arith.constant 0 : i32
    %9 = arith.cmpi eq, %arg1, %c0_i32_8 : i32
    %10 = arith.extui %9 : i1 to i32
    %c0_i32_9 = arith.constant 0 : i32
    %11 = arith.cmpi ne, %10, %c0_i32_9 : i32
    scf.if %11 {
      %12 = tpu.iota {dimensions = array<i32: 0>} : vector<16x1xi32>
      %c16_i32 = arith.constant 16 : i32
      %13 = arith.muli %arg0, %c16_i32 : i32
      %14 = vector.broadcast %13 : i32 to vector<16x1xi32>
      %15 = arith.addi %12, %14 : vector<16x1xi32>
      %c2_i32 = arith.constant 2 : i32
      %16 = vector.broadcast %c2_i32 : i32 to vector<16x1xi32>
      %17 = arith.cmpi slt, %15, %16 : vector<16x1xi32>
      %18 = arith.extui %17 : vector<16x1xi1> to vector<16x1xi32>
      %19 = arith.sitofp %18 : vector<16x1xi32> to vector<16x1xf32>
      %20 = tpu.iota {dimensions = array<i32: 1>} : vector<16x128xi32>
      %c0_10 = arith.constant 0 : index
      %c0_11 = arith.constant 0 : index
      %21 = vector.load %arg2[%c0_10, %c0_11] : memref<16x1xi32, #tpu.memory_space<vmem>>, vector<16x1xi32>
      %c0_12 = arith.constant 0 : index
      %c0_13 = arith.constant 0 : index
      %22 = vector.load %arg6[%c0_12, %c0_13] : memref<16x128xf32, #tpu.memory_space<vmem>>, vector<16x128xf32>
      %cst_14 = arith.constant dense<0xFF800000> : vector<16xf32>
      %23 = vector.multi_reduction <maximumf>, %22, %cst_14 [1] : vector<16x128xf32> to vector<16xf32>
      %24 = vector.shape_cast %23 : vector<16xf32> to vector<16x1xf32>
      %25 = vector.broadcast %24 : vector<16x1xf32> to vector<16x128xf32>
      %26 = arith.subf %22, %25 : vector<16x128xf32>
      %27 = math.exp %26 : vector<16x128xf32>
      %cst_15 = arith.constant dense<0.000000e+00> : vector<16xf32>
      %28 = vector.multi_reduction <add>, %27, %cst_15 [1] : vector<16x128xf32> to vector<16xf32>
      %29 = vector.shape_cast %28 : vector<16xf32> to vector<16x1xf32>
      %30 = math.log %29 : vector<16x1xf32>
      %31 = arith.addf %24, %30 : vector<16x1xf32>
      %32 = vector.broadcast %21 : vector<16x1xi32> to vector<16x128xi32>
      %33 = arith.cmpi eq, %20, %32 : vector<16x128xi32>
      %cst_16 = arith.constant 0.000000e+00 : f32
      %34 = vector.broadcast %cst_16 : f32 to vector<16x128xf32>
      %35 = arith.select %33, %22, %34 : vector<16x128xi1>, vector<16x128xf32>
      %cst_17 = arith.constant dense<0.000000e+00> : vector<16xf32>
      %36 = vector.multi_reduction <add>, %35, %cst_17 [1] : vector<16x128xf32> to vector<16xf32>
      %37 = vector.shape_cast %36 : vector<16xf32> to vector<16x1xf32>
      %38 = arith.subf %31, %37 : vector<16x1xf32>
      %39 = arith.mulf %38, %19 : vector<16x1xf32>
      %40 = vector.shape_cast %39 : vector<16x1xf32> to vector<1x16x1xf32>
      %cst_18 = arith.constant dense<0.000000e+00> : vector<1xf32>
      %41 = vector.multi_reduction <add>, %40, %cst_18 [1, 2] : vector<1x16x1xf32> to vector<1xf32>
      %42 = vector.shape_cast %41 : vector<1xf32> to vector<1x1x1xf32>
      %43 = vector.extract %42[0, 0, 0] : f32 from vector<1x1x1xf32>
      %c0_19 = arith.constant 0 : index
      %c0_20 = arith.constant 0 : index
      %44 = vector.load %arg9[%c0_19, %c0_20] : memref<16x128xf32, #tpu.memory_space<vmem>>, vector<16x128xf32>
      %c0_21 = arith.constant 0 : index
      %c0_22 = arith.constant 0 : index
      %45 = vector.load %arg7[%c0_21, %c0_22] : memref<16x128xf32, #tpu.memory_space<vmem>>, vector<16x128xf32>
      %cst_23 = arith.constant 0.333333343 : f32
      %46 = vector.broadcast %cst_23 : f32 to vector<16x128xf32>
      %47 = arith.mulf %44, %46 : vector<16x128xf32>
      %cst_24 = arith.constant dense<0xFF800000> : vector<16xf32>
      %48 = vector.multi_reduction <maximumf>, %47, %cst_24 [1] : vector<16x128xf32> to vector<16xf32>
      %49 = vector.shape_cast %48 : vector<16xf32> to vector<16x1xf32>
      %50 = vector.broadcast %49 : vector<16x1xf32> to vector<16x128xf32>
      %51 = arith.subf %47, %50 : vector<16x128xf32>
      %52 = math.exp %51 : vector<16x128xf32>
      %cst_25 = arith.constant dense<0.000000e+00> : vector<16xf32>
      %53 = vector.multi_reduction <add>, %52, %cst_25 [1] : vector<16x128xf32> to vector<16xf32>
      %54 = vector.shape_cast %53 : vector<16xf32> to vector<16x1xf32>
      %cst_26 = arith.constant 0.333333343 : f32
      %55 = vector.broadcast %cst_26 : f32 to vector<16x128xf32>
      %56 = arith.mulf %45, %55 : vector<16x128xf32>
      %cst_27 = arith.constant dense<0xFF800000> : vector<16xf32>
      %57 = vector.multi_reduction <maximumf>, %56, %cst_27 [1] : vector<16x128xf32> to vector<16xf32>
      %58 = vector.shape_cast %57 : vector<16xf32> to vector<16x1xf32>
      %59 = vector.broadcast %58 : vector<16x1xf32> to vector<16x128xf32>
      %60 = arith.subf %56, %59 : vector<16x128xf32>
      %61 = math.exp %60 : vector<16x128xf32>
      %cst_28 = arith.constant dense<0.000000e+00> : vector<16xf32>
      %62 = vector.multi_reduction <add>, %61, %cst_28 [1] : vector<16x128xf32> to vector<16xf32>
      %63 = vector.shape_cast %62 : vector<16xf32> to vector<16x1xf32>
      %64 = vector.broadcast %49 : vector<16x1xf32> to vector<16x128xf32>
      %65 = arith.subf %47, %64 : vector<16x128xf32>
      %66 = math.log %54 : vector<16x1xf32>
      %67 = vector.broadcast %66 : vector<16x1xf32> to vector<16x128xf32>
      %68 = arith.subf %65, %67 : vector<16x128xf32>
      %69 = vector.broadcast %58 : vector<16x1xf32> to vector<16x128xf32>
      %70 = arith.subf %56, %69 : vector<16x128xf32>
      %71 = math.log %63 : vector<16x1xf32>
      %72 = vector.broadcast %71 : vector<16x1xf32> to vector<16x128xf32>
      %73 = arith.subf %70, %72 : vector<16x128xf32>
      %74 = arith.subf %68, %73 : vector<16x128xf32>
      %75 = arith.mulf %52, %74 : vector<16x128xf32>
      %cst_29 = arith.constant dense<0.000000e+00> : vector<16xf32>
      %76 = vector.multi_reduction <add>, %75, %cst_29 [1] : vector<16x128xf32> to vector<16xf32>
      %77 = vector.shape_cast %76 : vector<16xf32> to vector<16x1xf32>
      %78 = tpu.reciprocal %54 {approx = true} : vector<16x1xf32> -> vector<16x1xf32>
      %79 = arith.mulf %77, %78 : vector<16x1xf32>
      %80 = arith.mulf %79, %19 : vector<16x1xf32>
      %81 = vector.shape_cast %80 : vector<16x1xf32> to vector<1x16x1xf32>
      %cst_30 = arith.constant dense<0.000000e+00> : vector<1xf32>
      %82 = vector.multi_reduction <add>, %81, %cst_30 [1, 2] : vector<1x16x1xf32> to vector<1xf32>
      %83 = vector.shape_cast %82 : vector<1xf32> to vector<1x1x1xf32>
      %84 = vector.extract %83[0, 0, 0] : f32 from vector<1x1x1xf32>
      %85 = tpu.iota {dimensions = array<i32: 1>} : vector<1x8x128xi32>
      %c0_i32_31 = arith.constant 0 : i32
      %86 = vector.broadcast %c0_i32_31 : i32 to vector<1x8x128xi32>
      %87 = arith.cmpi eq, %85, %86 : vector<1x8x128xi32>
      %c1_i32 = arith.constant 1 : i32
      %88 = vector.broadcast %c1_i32 : i32 to vector<1x8x128xi32>
      %89 = arith.cmpi eq, %85, %88 : vector<1x8x128xi32>
      %cst_32 = arith.constant 0.000000e+00 : f32
      %90 = vector.broadcast %84 : f32 to vector<1x8x128xf32>
      %91 = vector.broadcast %cst_32 : f32 to vector<1x8x128xf32>
      %92 = arith.select %89, %90, %91 : vector<1x8x128xi1>, vector<1x8x128xf32>
      %93 = vector.broadcast %43 : f32 to vector<1x8x128xf32>
      %94 = arith.select %87, %93, %92 : vector<1x8x128xi1>, vector<1x8x128xf32>
      %c0_33 = arith.constant 0 : index
      %c0_34 = arith.constant 0 : index
      %c0_35 = arith.constant 0 : index
      %95 = vector.load %arg8[%c0_33, %c0_34, %c0_35] : memref<1x8x128xf32, #tpu.memory_space<vmem>>, vector<1x8x128xf32>
      tpu.vector_store %arg8[%c0_33, %c0_34, %c0_35], %94 {strides = array<i32>} : memref<1x8x128xf32, #tpu.memory_space<vmem>>, vector<1x8x128xf32>,
    } else {
    }
    return
  }
  func.func @transform_0(%arg0: i32, %arg1: i32) -> (i32, i32) {
    %c0_i32 = arith.constant 0 : i32
    %c0_i32_0 = arith.constant 0 : i32
    return %arg0, %c0_i32 : i32, i32
  }
  func.func @transform_1(%arg0: i32, %arg1: i32) -> (i32, i32) {
    %c0_i32 = arith.constant 0 : i32
    return %arg0, %arg1 : i32, i32
  }
  func.func @transform_2(%arg0: i32, %arg1: i32) -> (i32, i32) {
    %c0_i32 = arith.constant 0 : i32
    %c0_i32_0 = arith.constant 0 : i32
    return %arg1, %c0_i32 : i32, i32
  }
  func.func @transform_3(%arg0: i32, %arg1: i32) -> (i32, i32) {
    %c0_i32 = arith.constant 0 : i32
    %c0_i32_0 = arith.constant 0 : i32
    %c0_i32_1 = arith.constant 0 : i32
    return %c0_i32, %c0_i32_0 : i32, i32
  }
  func.func @transform_4(%arg0: i32, %arg1: i32) -> (i32, i32) {
    %c0_i32 = arith.constant 0 : i32
    %c0_i32_0 = arith.constant 0 : i32
    return %arg0, %c0_i32 : i32, i32
  }
  func.func @transform_5(%arg0: i32, %arg1: i32) -> (i32, i32) {
    %c0_i32 = arith.constant 0 : i32
    %c0_i32_0 = arith.constant 0 : i32
    return %arg0, %c0_i32 : i32, i32
  }
  func.func @transform_6(%arg0: i32, %arg1: i32) -> (i32, i32, i32) {
    %c0_i32 = arith.constant 0 : i32
    %c0_i32_0 = arith.constant 0 : i32
    %c0_i32_1 = arith.constant 0 : i32
    return %arg0, %c0_i32, %c0_i32_0 : i32, i32, i32
  }
}

</mosaic_0001>

<bundles_post_ra>
// kernel: tpu_custom_call.1
= control target key start
LH: loop header
LB: loop body
LE: loop exit
PB: predicated region body
PF: predicated region fallthrough
CT: control target
= control target key end

     0   :  { %11 = vsyncpa [#allocation4], 0  ;;  %s1469_s0 = inlined_call_operand.vmem [shape: s32[16,1], index: 0, kind: input, shape index: {}]   ;;  %s1470_s1 = inlined_call_operand.hbm [shape: bf16[16,1024], index: 1, kind: input, shape index: {}]   ;;  %s1471_s2 = inlined_call_operand.hbm [shape: bf16[1024,128], index: 2, kind: input, shape index: {}]   ;;  %s1472_s3 = inlined_call_operand.hbm [shape: f32[1,128], index: 3, kind: input, shape index: {}]   ;;  %s1473_s4 = inlined_call_operand.vmem [shape: f32[16,128], index: 4, kind: input, shape index: {}]   ;;  %s1474_s5 = inlined_call_operand.vmem [shape: f32[16,128], index: 5, kind: input, shape index: {}]   ;;  %s1475_s6 = inlined_call_operand.hbm [shape: f32[1,8,128], index: 6, kind: output, shape index: {}]  }
   0x1   :  { %12 = vsyncpa [#allocation7], 0 }
   0x2   :  { %13 = vsyncpa [#allocation5], 0  ;;  %s1341_s21 = smov [#allocation6]   ;;  %s1247_s25 = scalar_lea.hbm %s1471_s2, 8192 }
   0x3   :  { %s33_s22 = sshll.u32 %s1341_s21, 4  ;;  %p1248_p0 = scmp.ne.s32.totalorder %s1471_s2, %s1247_s25  ;;  %s34_s22 = int_to_ptr.vmem [resolvable:$true] %s33_s22 }
   0x4   :  { %p1251_p1 = scmp.lt.u32.totalorder %s1247_s25, %s1471_s2 }
   0x6   :  { %p1253_p2 = pnand %p1251_p1, %p1248_p0 }
   0x8   :  { %1256 = shalt.err (!%p1253_p2)
}
   0x9   :  { %s1257_s30 = scalar_lea.vmem %s34_s22, 8192  ;;  %p1262_p4 = scmp.lt.s32.totalorder %s34_s22, %s34_s22 }
   0xa   :  { %p1258_p3 = scmp.ne.s32.totalorder %s34_s22, %s1257_s30  ;;  %p1263_p5 = scmp.lt.s32.totalorder %s1257_s30, %s1257_s30 }
   0xc   :  { %p1264_p6 = por %p1263_p5, %p1262_p4 }
   0xe   :  { %p1265_p7 = pnand %p1264_p6, %p1258_p3 }
  0x10   :  { %1268 = shalt.err (!%p1265_p7)
}
  0x11   :  { %s1342_s7 = smov 64   ;;  %s1343_s8 = smov 4  }
  0x12   :  { %39 = dma.hbm_to_vmem [thread:$0]  %s1471_s2, 8192, %s34_s22, [#allocation7], %s1342_s7, %s1342_s7, %s1343_s8  }
  0x13   :  { %s1344_s11 = smov [#allocation3]   ;;  %s1269_s15 = scalar_lea.hbm %s1470_s1, 1024 }
  0x14   :  { %s21_s12 = sshll.u32 %s1344_s11, 4  ;;  %p1270_p8 = scmp.ne.s32.totalorder %s1470_s1, %s1269_s15  ;;  %s22_s12 = int_to_ptr.vmem [resolvable:$true] %s21_s12 }
  0x15   :  { %p1273_p9 = scmp.lt.u32.totalorder %s1269_s15, %s1470_s1 }
  0x17   :  { %p1275_p10 = pnand %p1273_p9, %p1270_p8 }
  0x19   :  { %1278 = shalt.err (!%p1275_p10)
}
  0x1a   :  { %s1279_s20 = scalar_lea.vmem %s22_s12, 1024  ;;  %p1284_p12 = scmp.lt.s32.totalorder %s22_s12, %s22_s12 }
  0x1b   :  { %p1280_p11 = scmp.ne.s32.totalorder %s22_s12, %s1279_s20  ;;  %p1285_p13 = scmp.lt.s32.totalorder %s1279_s20, %s1279_s20 }
  0x1d   :  { %p1286_p0 = por %p1285_p13, %p1284_p12 }
  0x1f   :  { %p1287_p1 = pnand %p1286_p0, %p1280_p11 }
  0x21   :  { %1290 = shalt.err (!%p1287_p1)
}
  0x22   :  { %s1345_s2 = smov 512   ;;  %s1346_s21 = smov 32  }
  0x23   :  { %27 = dma.hbm_to_vmem [thread:$0]  %s1470_s1, 1024, %s22_s12, [#allocation4], %s1345_s2, %s1345_s2, %s1346_s21  }
  0x24   :  { %s1347_s24 = smov [#allocation8]   ;;  %s1291_s28 = scalar_lea.hbm %s1472_s3, 16 }
  0x25   :  { %s46_s25 = sshll.u32 %s1347_s24, 4  ;;  %p1292_p2 = scmp.ne.s32.totalorder %s1472_s3, %s1291_s28  ;;  %s47_s25 = int_to_ptr.vmem [resolvable:$true] %s46_s25 }
  0x26   :  { %p1295_p3 = scmp.lt.u32.totalorder %s1291_s28, %s1472_s3 }
  0x28   :  { %p1297_p4 = pnand %p1295_p3, %p1292_p2 }
  0x2a   :  { %1300 = shalt.err (!%p1297_p4)
}
  0x2b   :  { %s1301_s9 = scalar_lea.vmem %s47_s25, 16  ;;  %s1305_s1 = scalar_lea.vmem %s47_s25, 32 }
  0x2c   :  { %p1302_p5 = scmp.ne.s32.totalorder %s47_s25, %s1301_s9  ;;  %p1306_p6 = scmp.lt.s32.totalorder %s47_s25, %s47_s25 }
  0x2d   :  { %p1307_p7 = scmp.lt.s32.totalorder %s1305_s1, %s1301_s9 }
  0x2f   :  { %p1308_p8 = por %p1307_p7, %p1306_p6 }
  0x31   :  { %p1309_p9 = pnand %p1308_p8, %p1302_p5 }
  0x33   :  { %1312 = shalt.err (!%p1309_p9)
}
  0x34   :  { %49 = dma.hbm_to_vmem [thread:$0]  %s1472_s3, 16, %s47_s25, [#allocation7]  }
  0x35   :  { %1335 = dma.done.wait [#allocation4], 1024  }
  0x36   :  { %1336 = vsyncadd [#allocation4], 4294966272 }
  0x37   :  { %1337 = dma.done.wait [#allocation7], 8208  }
  0x38   :  { %1338 = vsyncadd [#allocation7], 4294959088  ;;  %v1155_v0 = vld [vmem:[#allocation6 + $0x40] sm:$0xff]   ;;  %v1159_v4 = vld [vmem:[#allocation6 + $0x48] sm:$0xff]   ;;  %vm867_vm3 = vcmask 7168   ;;  %s1350_s2 = smov [#allocation9]  }
  0x39   :  { %v1156_v1 = vld [vmem:[#allocation6 + $0xc0] sm:$0xff]   ;;  %1051 = vmatprep.subr.bf16.mxu0 %v1155_v0  ;;  %v1160_v5 = vld [vmem:[#allocation6 + $0xc8] sm:$0xff]   ;;  %v1163_v8 = vld [vmem:[#allocation6 + $0x50] sm:$0xff]   ;;  %s967_s21 = sshll.u32 %s1350_s2, 4  ;;  %s968_s21 = int_to_ptr.vmem [resolvable:$true] %s967_s21 }
  0x3a   :  { %v1157_v2 = vld [vmem:[#allocation6] sm:$0xff]   ;;  %1073 = vmatprep.subr.bf16.mxu1 %v1156_v1  ;;  %v1161_v6 = vld [vmem:[#allocation6 + $0x8] sm:$0xff]   ;;  %v1164_v9 = vld [vmem:[#allocation6 + $0xd0] sm:$0xff]   ;;  %s1313_s23 = scalar_lea.vmem %s968_s21, 128  ;;  %p1318_p11 = scmp.lt.s32.totalorder %s968_s21, %s968_s21 }
  0x3b   :  { %v1158_v3 = vld [vmem:[#allocation6 + $0x80] sm:$0xff]   ;;  %1052 = vmatpush3.bf16.msra.mxu0 %v1157_v2  ;;  %v1162_v7 = vld [vmem:[#allocation6 + $0x88] sm:$0xff]   ;;  %v1165_v10 = vld [vmem:[#allocation6 + $0x10] sm:$0xff]   ;;  %p1314_p10 = scmp.ne.s32.totalorder %s968_s21, %s1313_s23  ;;  %p1319_p12 = scmp.lt.s32.totalorder %s1313_s23, %s1313_s23 }
  0x3c   :  { %1074 = vmatpush3.bf16.msra.mxu1 %v1158_v3  ;;  %1053 = vmatprep.subr.bf16.mxu0 %v1159_v4  ;;  %v1166_v11 = vld [vmem:[#allocation6 + $0x90] sm:$0xff]   ;;  %v1167_v12 = vld [vmem:[#allocation6 + $0x58] sm:$0xff]   ;;  %v1171_v16 = vld [vmem:[#allocation6 + $0x60] sm:$0xff]  }
  0x3d   :  { %1075 = vmatprep.subr.bf16.mxu1 %v1160_v5  ;;  %v1168_v13 = vld [vmem:[#allocation6 + $0xd8] sm:$0xff]   ;;  %v1172_v17 = vld [vmem:[#allocation6 + $0xe0] sm:$0xff]   ;;  %v1175_v20 = vld [vmem:[#allocation6 + $0x68] sm:$0xff]   ;;  %p1320_p13 = por %p1319_p12, %p1318_p11 }
  0x3e   :  { %v1169_v14 = vld [vmem:[#allocation6 + $0x18] sm:$0xff]   ;;  %v1173_v18 = vld [vmem:[#allocation6 + $0x20] sm:$0xff]   ;;  %v1176_v21 = vld [vmem:[#allocation6 + $0xe8] sm:$0xff]  }
  0x3f   :  { %1054 = vmatpush3.bf16.msra.mxu0 %v1161_v6  ;;  %v1170_v15 = vld [vmem:[#allocation6 + $0x98] sm:$0xff]   ;;  %v1174_v19 = vld [vmem:[#allocation6 + $0xa0] sm:$0xff]   ;;  %v1177_v22 = vld [vmem:[#allocation6 + $0x28] sm:$0xff]   ;;  %p1321_p0 = pnand %p1320_p13, %p1314_p10 }
  0x40   :  { %1076 = vmatpush3.bf16.msra.mxu1 %v1162_v7  ;;  %1055 = vmatprep.subr.bf16.mxu0 %v1163_v8  ;;  %v1178_v23 = vld [vmem:[#allocation6 + $0xa8] sm:$0xff]   ;;  %v1179_v24 = vld [vmem:[#allocation6 + $0x70] sm:$0xff]   ;;  %v1183_v28 = vld [vmem:[#allocation6 + $0x78] sm:$0xff]  }
  0x41   :  { %1077 = vmatprep.subr.bf16.mxu1 %v1164_v9  ;;  %v1180_v25 = vld [vmem:[#allocation6 + $0xf0] sm:$0xff]   ;;  %v1184_v29 = vld [vmem:[#allocation6 + $0xf8] sm:$0xff]   ;;  %v79_v32 = vld [vmem:[#allocation3] sm:$0xff] }
  0x42   :  { %v1181_v26 = vld [vmem:[#allocation6 + $0x30] sm:$0xff]   ;;  %v1185_v30 = vld [vmem:[#allocation6 + $0x38] sm:$0xff]   ;;  %v83_v33 = vld [vmem:[#allocation3 + $0x20] sm:$0xff] }
  0x43   :  { %1056 = vmatpush3.bf16.msra.mxu0 %v1165_v10  ;;  %v1182_v27 = vld [vmem:[#allocation6 + $0xb0] sm:$0xff]   ;;  %v1186_v31 = vld [vmem:[#allocation6 + $0xb8] sm:$0xff]   ;;  %v80_v34 = vld [vmem:[#allocation3 + $0x8] sm:$0xff]  ;;  %v978_v35 = vcombine.low %v79_v32, %v83_v33  ;;  %v979_v36 = vcombine.high %v79_v32, %v83_v33 }
  0x44   :  { %1078 = vmatpush3.bf16.msra.mxu1 %v1166_v11  ;;  %1057 = vmatprep.subr.bf16.mxu0 %v1167_v12  ;;  %v84_v37 = vld [vmem:[#allocation3 + $0x28] sm:$0xff]  ;;  %v1187_v40 = vld [vmem:[#allocation6 + $0x140] sm:$0xff]   ;;  %v1195_v48 = vld [vmem:[#allocation6 + $0x150] sm:$0xff]  }
  0x45   :  { %1079 = vmatprep.subr.bf16.mxu1 %v1168_v13  ;;  %v980_v38 = vcombine.low %v80_v34, %v84_v37  ;;  %v981_v39 = vcombine.high %v80_v34, %v84_v37  ;;  %671 = vmatprep.mubr.bf16.mxu0 %v979_v36  ;;  %v1188_v41 = vld [vmem:[#allocation6 + $0x1c0] sm:$0xff]   ;;  %v1191_v44 = vld [vmem:[#allocation6 + $0x148] sm:$0xff]   ;;  %v1196_v49 = vld [vmem:[#allocation6 + $0x1d0] sm:$0xff]  }
  0x46   :  { %v1189_v42 = vld [vmem:[#allocation6 + $0x100] sm:$0xff]   ;;  %v1192_v45 = vld [vmem:[#allocation6 + $0x1c8] sm:$0xff]   ;;  %v1197_v50 = vld [vmem:[#allocation6 + $0x110] sm:$0xff]  }
  0x47   :  { %1058 = vmatpush3.bf16.msra.mxu0 %v1169_v14  ;;  %712 = vmatprep.mubr.bf16.mxu1 %v981_v39  ;;  %v1190_v43 = vld [vmem:[#allocation6 + $0x180] sm:$0xff]   ;;  %v1193_v46 = vld [vmem:[#allocation6 + $0x108] sm:$0xff]   ;;  %v1198_v51 = vld [vmem:[#allocation6 + $0x190] sm:$0xff]  }
  0x48   :  { %1080 = vmatpush3.bf16.msra.mxu1 %v1170_v15  ;;  %1059 = vmatprep.subr.bf16.mxu0 %v1171_v16  ;;  %v1194_v47 = vld [vmem:[#allocation6 + $0x188] sm:$0xff]   ;;  %v1199_v52 = vld [vmem:[#allocation6 + $0x158] sm:$0xff]   ;;  %v1203_v56 = vld [vmem:[#allocation6 + $0x160] sm:$0xff]  }
  0x49   :  { %1081 = vmatprep.subr.bf16.mxu1 %v1172_v17  ;;  %v1200_v53 = vld [vmem:[#allocation6 + $0x1d8] sm:$0xff]   ;;  %v1204_v57 = vld [vmem:[#allocation6 + $0x1e0] sm:$0xff]   ;;  %v1207_v60 = vld [vmem:[#allocation6 + $0x168] sm:$0xff]  }
  0x4a   :  { %v1201_v54 = vld [vmem:[#allocation6 + $0x118] sm:$0xff]   ;;  %v1205_v58 = vld [vmem:[#allocation6 + $0x120] sm:$0xff]   ;;  %v1208_v61 = vld [vmem:[#allocation6 + $0x1e8] sm:$0xff]  }
  0x4b   :  { %1060 = vmatpush3.bf16.msra.mxu0 %v1173_v18  ;;  %v1202_v55 = vld [vmem:[#allocation6 + $0x198] sm:$0xff]   ;;  %v1206_v59 = vld [vmem:[#allocation6 + $0x1a0] sm:$0xff]   ;;  %v1209_v62 = vld [vmem:[#allocation6 + $0x128] sm:$0xff]  }
  0x4c   :  { %1082 = vmatpush3.bf16.msra.mxu1 %v1174_v19  ;;  %1061 = vmatprep.subr.bf16.mxu0 %v1175_v20  ;;  %v1210_v63 = vld [vmem:[#allocation6 + $0x1a8] sm:$0xff]   ;;  %v1211_v0 = vld [vmem:[#allocation6 + $0x170] sm:$0xff]   ;;  %v1215_v4 = vld [vmem:[#allocation6 + $0x178] sm:$0xff]  }
  0x4d   :  { %1083 = vmatprep.subr.bf16.mxu1 %v1176_v21  ;;  %v1212_v1 = vld [vmem:[#allocation6 + $0x1f0] sm:$0xff]   ;;  %v1216_v5 = vld [vmem:[#allocation6 + $0x1f8] sm:$0xff]   ;;  %v882_v14 = vld [vmem:[%s1474_s5] sm:$0xff] }
  0x4e   :  { %v1213_v2 = vld [vmem:[#allocation6 + $0x130] sm:$0xff]   ;;  %v1217_v6 = vld [vmem:[#allocation6 + $0x138] sm:$0xff]   ;;  %v900_v17 = vmul.f32 0.33333334, %v882_v14  ;;  %v883_v18 = vld [vmem:[%s1474_s5 + $0x8] sm:$0xff] }
  0x4f   :  { %1062 = vmatpush3.bf16.msra.mxu0 %v1177_v22  ;;  %v1214_v3 = vld [vmem:[#allocation6 + $0x1b0] sm:$0xff]   ;;  %v1218_v7 = vld [vmem:[#allocation6 + $0x1b8] sm:$0xff]   ;;  %v901_v19 = vmul.f32 0.33333334, %v883_v18  ;;  %v1431_v20 = vld [vmem:[%s1473_s4 + $0x8] sm:$0xff] }
  0x50   :  { %1084 = vmatpush3.bf16.msra.mxu1 %v1178_v23  ;;  %1063 = vmatprep.subr.bf16.mxu0 %v1179_v24  ;;  %v81_v8 = vld [vmem:[#allocation3 + $0x10] sm:$0xff]  ;;  %v82_v12 = vld [vmem:[#allocation3 + $0x18] sm:$0xff] }
  0x51   :  { %1085 = vmatprep.subr.bf16.mxu1 %v1180_v25  ;;  %v85_v9 = vld [vmem:[#allocation3 + $0x30] sm:$0xff]  ;;  %v86_v13 = vld [vmem:[#allocation3 + $0x38] sm:$0xff]  ;;  %902 = vmax.xlane.f32.xlu1 %v900_v17 }
  0x52   :  { %v982_v10 = vcombine.low %v81_v8, %v85_v9  ;;  %v983_v11 = vcombine.high %v81_v8, %v85_v9  ;;  %v984_v15 = vcombine.low %v82_v12, %v86_v13  ;;  %v985_v16 = vcombine.high %v82_v12, %v86_v13 }
  0x53   :  { %1064 = vmatpush3.bf16.msra.mxu0 %v1181_v26 }
  0x54   :  { %1086 = vmatpush3.bf16.msra.mxu1 %v1182_v27  ;;  %1065 = vmatprep.subr.bf16.mxu0 %v1183_v28 }
  0x55   :  { %1087 = vmatprep.subr.bf16.mxu1 %v1184_v29  ;;  %904 = vmax.xlane.f32.xlu1 %v901_v19 }
  0x57   :  { %1066 = vmatpush3.bf16.msra.mxu0 %v1185_v30 }
  0x58   :  { %1088 = vmatpush3.bf16.msra.mxu1 %v1186_v31  ;;  %1095 = vmatprep.subr.bf16.mxu0 %v1187_v40 }
  0x59   :  { %1117 = vmatprep.subr.bf16.mxu1 %v1188_v41  ;;  %831 = vmax.xlane.f32.xlu1 %v1431_v20 }
  0x5a   :  { %672 = vmatmul.mubr.bf16.vlgmr.msra.gmra.mrb[0].mxu0 %v978_v35 }
  0x5b   :  { %713 = vmatmul.mubr.bf16.vlgmr.msra.gmra.mrb[0].mxu1 %v980_v38  ;;  %1096 = vmatpush3.bf16.msra.mxu0 %v1189_v42 }
  0x5c   :  { %1118 = vmatpush3.bf16.msra.mxu1 %v1190_v43  ;;  %1097 = vmatprep.subr.bf16.mxu0 %v1191_v44 }
  0x5d   :  { %1119 = vmatprep.subr.bf16.mxu1 %v1192_v45  ;;  %753 = vmatprep.mubr.bf16.mxu0 %v983_v11  ;;  %v825_v11 = vld [vmem:[%s1469_s0] sm:$0xff] }
  0x5e   :  { %794 = vmatprep.mubr.bf16.mxu1 %v985_v16 }
  0x5f   :  { %1098 = vmatpush3.bf16.msra.mxu0 %v1193_v46 }
  0x60   :  { %1120 = vmatpush3.bf16.msra.mxu1 %v1194_v47  ;;  %1099 = vmatprep.subr.bf16.mxu0 %v1195_v48 }
  0x61   :  { %1121 = vmatprep.subr.bf16.mxu1 %v1196_v49 }
  0x63   :  { %1100 = vmatpush3.bf16.msra.mxu0 %v1197_v50 }
  0x64   :  { %1122 = vmatpush3.bf16.msra.mxu1 %v1198_v51  ;;  %1101 = vmatprep.subr.bf16.mxu0 %v1199_v52 }
  0x65   :  { %1123 = vmatprep.subr.bf16.mxu1 %v1200_v53 }
  0x67   :  { %1102 = vmatpush3.bf16.msra.mxu0 %v1201_v54  ;;  %v977_v54 = vld [vmem:[#allocation8] ss:$0 sm:$0xff] }
  0x68   :  { %1124 = vmatpush3.bf16.msra.mxu1 %v1202_v55  ;;  %1103 = vmatprep.subr.bf16.mxu0 %v1203_v56 }
  0x69   :  { %1125 = vmatprep.subr.bf16.mxu1 %v1204_v57 }
  0x6b   :  { %1104 = vmatpush3.bf16.msra.mxu0 %v1205_v58 }
  0x6c   :  { %1126 = vmatpush3.bf16.msra.mxu1 %v1206_v59  ;;  %1105 = vmatprep.subr.bf16.mxu0 %v1207_v60 }
  0x6d   :  { %1127 = vmatprep.subr.bf16.mxu1 %v1208_v61 }
  0x6f   :  { %1106 = vmatpush3.bf16.msra.mxu0 %v1209_v62 }
  0x70   :  { %1128 = vmatpush3.bf16.msra.mxu1 %v1210_v63  ;;  %1107 = vmatprep.subr.bf16.mxu0 %v1211_v0  ;;  %v827_v63 = vld [vmem:[%s1473_s4] sm:$0xff] }
  0x71   :  { %1129 = vmatprep.subr.bf16.mxu1 %v1212_v1  ;;  %v1348_v1 = vmov 0  }
  0x72   :  { %1154 = vset.pattern.permute.xlu1 %v1348_v1  ;;  %1153 = vset.pattern.permute.xlu0 %v1348_v1 }
  0x73   :  { %1108 = vmatpush3.bf16.msra.mxu0 %v1213_v2 }
  0x74   :  { %1130 = vmatpush3.bf16.msra.mxu1 %v1214_v3  ;;  %1109 = vmatprep.subr.bf16.mxu0 %v1215_v4 }
  0x75   :  { %1131 = vmatprep.subr.bf16.mxu1 %v1216_v5 }
  0x77   :  { %1110 = vmatpush3.bf16.msra.mxu0 %v1217_v6 }
  0x78   :  { %1132 = vmatpush3.bf16.msra.mxu1 %v1218_v7 }
  0x7a   :  { %754 = vmatmul.mubr.bf16.vlgmr.msra.gmra.mrb[4].mxu0 %v982_v10  ;;  %v826_v10 = vld [vmem:[%s1469_s0 + $0x8] sm:$0xff] }
  0x7b   :  { %795 = vmatmul.mubr.bf16.vlgmr.msra.gmra.mrb[4].mxu1 %v984_v15 }
  0xde   :  { %v903_v21 = vpop.xlane.xlu1 %902 }
  0xdf   :  { %v1437_v46 = vsub.f32 %v900_v17, %v903_v21 }
  0xe1   :  { %v908_v57 = vmul.f32 1.442695, %v1437_v46 }
  0xe2   :  { %v905_v22 = vpop.xlane.xlu1 %904 }
  0xe3   :  { %v1434_v23 = vsub.f32 %v901_v19, %v905_v22 }
  0xe5   :  { %v910_v24 = vmul.f32 1.442695, %v1434_v23 }
  0xe6   :  { %v1449_v12 = vpop.xlane.xlu1 %831 }
  0xe7   :  { %1219 = vpow2.f32 %v910_v24  ;;  %v834_v13 = vsub.f32 %v1431_v20, %v1449_v12 }
  0xe8   :  { %1221 = vpow2.f32 %v908_v57 }
  0xe9   :  { %v837_v15 = vmul.f32 1.442695, %v834_v13 }
  0xf1   :  { %v1220_v25 = vpop.eup %1219 }
  0xf2   :  { %914 = vadd.xlane.f32.xlu1 %v1220_v25  ;;  %v1222_v0 = vpop.eup %1221  ;;  %v810_v25 = vlaneseq }
 0x12d   :  { %v1067_v26 = vpop.f32.mrb[0].mxu0 }
 0x12e   :  { %v1089_v27 = vpop.f32.mrb[0].mxu1  ;;  %v1068_v28 = vpop.f32.mrb[1].mxu0 }
 0x12f   :  { %v1069_v29 = vadd.f32 %v1068_v28, %v1067_v26  ;;  %v1090_v30 = vpop.f32.mrb[1].mxu1  ;;  %v1070_v31 = vpop.f32.mrb[2].mxu0 }
 0x130   :  { %v1091_v32 = vadd.f32 %v1090_v30, %v1089_v27  ;;  %v1092_v33 = vpop.f32.mrb[2].mxu1  ;;  %v1071_v34 = vpop.f32.mrb[3].mxu0  ;;  %v824_v27 = vand.u32 127, %v810_v25 }
 0x131   :  { %v1072_v35 = vadd.f32 %v1071_v34, %v1070_v31  ;;  %v1093_v36 = vpop.f32.mrb[3].mxu1 }
 0x132   :  { %v715_v37 = vadd.f32 %v1091_v32, %v1069_v29  ;;  %v1094_v38 = vadd.f32 %v1093_v36, %v1092_v33 }
 0x134   :  { %v718_v39 = vadd.f32 %v1094_v38, %v1072_v35 }
 0x14d   :  { %v1111_v40 = vpop.f32.mrb[4].mxu0 }
 0x14e   :  { %v1133_v41 = vpop.f32.mrb[4].mxu1  ;;  %v1112_v42 = vpop.f32.mrb[5].mxu0 }
 0x14f   :  { %v1113_v43 = vadd.f32 %v1112_v42, %v1111_v40  ;;  %v1134_v44 = vpop.f32.mrb[5].mxu1  ;;  %v1114_v45 = vpop.f32.mrb[6].mxu0 }
 0x150   :  { %v1135_v47 = vadd.f32 %v1134_v44, %v1133_v41  ;;  %v1136_v48 = vpop.f32.mrb[6].mxu1  ;;  %v1115_v49 = vpop.f32.mrb[7].mxu0 }
 0x151   :  { %v756_v50 = vadd.f32 %v1113_v43, %v715_v37  ;;  %v1116_v51 = vadd.f32 %v1115_v49, %v1114_v45  ;;  %v1137_v52 = vpop.f32.mrb[7].mxu1 }
 0x152   :  { %v1138_v53 = vadd.f32 %v1137_v52, %v1136_v48 }
 0x153   :  { %v797_v55 = vadd.f32 %v1135_v47, %v756_v50  ;;  %v759_v56 = vadd.f32 %v1116_v51, %v718_v39  ;;  %v811_v51 = vshrl.u32 %v810_v25, 7 }
 0x155   :  { %v800_v58 = vadd.f32 %v1138_v53, %v759_v56  ;;  %v803_v59 = vadd.f32 %v977_v54, %v797_v55  ;;  %vm817_vm2 = vcmp.lt.s32.totalorder %v811_v51, 2  ;;  %v1349_v56 = vmov 0.0  }
 0x156   :  { %v1050_v57 = vsel %vm817_vm2, 1.0, %v1349_v56  ;;  %vm955_vm4 = vcmp.eq.s32.totalorder %v811_v51, 1  ;;  %vm954_vm5 = vcmp.eq.s32.totalorder %v811_v51, 0 }
 0x157   :  { %v884_v60 = vmul.f32 0.33333334, %v803_v59  ;;  %v804_v61 = vadd.f32 %v977_v54, %v800_v58 }
 0x159   :  { %886 = vmax.xlane.f32.xlu0 %v884_v60  ;;  %v885_v62 = vmul.f32 0.33333334, %v804_v61 }
 0x15d   :  { %888 = vmax.xlane.f32.xlu0 %v885_v62 }
 0x161   :  { %829 = vmax.xlane.f32.xlu0 %v827_v63 }
 0x165   :  { %912 = vadd.xlane.f32.xlu0 %v1222_v0 }
 0x17f   :  { %v915_v22 = vpop.xlane.xlu1 %914 }
 0x1e6   :  { %v887_v2 = vpop.xlane.xlu0 %886 }
 0x1e7   :  { %v890_v3 = vsub.f32 %v884_v60, %v887_v2 }
 0x1e9   :  { %v892_v4 = vmul.f32 1.442695, %v890_v3 }
 0x1ea   :  { %v889_v5 = vpop.xlane.xlu0 %888 }
 0x1eb   :  { %1223 = vpow2.f32 %v892_v4  ;;  %v891_v6 = vsub.f32 %v885_v62, %v889_v5 }
 0x1ed   :  { %v894_v7 = vmul.f32 1.442695, %v891_v6 }
 0x1ee   :  { %v830_v14 = vpop.xlane.xlu0 %829 }
 0x1ef   :  { %1225 = vpow2.f32 %v894_v7  ;;  %v833_v16 = vsub.f32 %v827_v63, %v830_v14 }
 0x1f0   :  { %1227 = vpow2.f32 %v837_v15 }
 0x1f1   :  { %v835_v17 = vmul.f32 1.442695, %v833_v16 }
 0x1f2   :  { %v913_v21 = vpop.xlane.xlu0 %912 }
 0x1f3   :  { %1229 = vpow2.f32 %v835_v17 }
 0x1f4   :  { %1231 = vlog2.f32 %v913_v21 }
 0x1f5   :  { %v1224_v8 = vpop.eup %1223  ;;  %1233 = vlog2.f32 %v915_v22 }
 0x1f6   :  { %896 = vadd.xlane.f32.xlu0 %v1224_v8 }
 0x1f9   :  { %v1226_v9 = vpop.eup %1225 }
 0x1fa   :  { %898 = vadd.xlane.f32.xlu1 %v1226_v9  ;;  %v1228_v18 = vpop.eup %1227 }
 0x1fd   :  { %v1230_v19 = vpop.eup %1229 }
 0x1fe   :  { %v1232_v28 = vpop.eup %1231 }
 0x1ff   :  { %v1234_v31 = vpop.eup %1233  ;;  %v923_v32 = vmul.f32 0.6931472, %v1232_v28 }
 0x200   :  { %v925_v37 = vmul.f32 0.6931472, %v1234_v31 }
 0x201   :  { %v926_v38 = vsub.f32 %v1437_v46, %v923_v32 }
 0x202   :  { %v927_v43 = vsub.f32 %v1434_v23, %v925_v37 }
 0x20b   :  { %853 = vperm.xlu1 %1154, %v826_v10  }
 0x20c   :  { %850 = vperm.xlu0 %1153, %v825_v11  }
 0x22b   :  { %841 = vadd.xlane.f32.xlu0 %v1228_v18 }
 0x22f   :  { %839 = vadd.xlane.f32.xlu1 %v1230_v19 }
 0x283   :  { %v897_v24 = vpop.xlane.xlu0 %896 }
 0x284   :  { %1235 = vlog2.f32 %v897_v24 }
 0x287   :  { %v899_v26 = vpop.xlane.xlu1 %898 }
 0x288   :  { %1237 = vlog2.f32 %v899_v26 }
 0x28b   :  { %v851_v29 = vpop.permute.xlu0 %850  ;;  %v854_v30 = vpop.permute.xlu1 %853 }
 0x28c   :  { %vm855_vm0 = vcmp.eq.s32.totalorder %v824_v27, %v851_v29  ;;  %vm856_vm1 = vcmp.eq.s32.totalorder %v824_v27, %v854_v30 }
 0x28d   :  { %v857_v33 = vsel %vm855_vm0, %v827_v63, 0.0  ;;  %v858_v36 = vsel %vm856_vm1, %v1431_v20, 0.0 }
 0x28e   :  { %v1236_v34 = vpop.eup %1235  ;;  %859 = vadd.xlane.f32.xlu1 %v857_v33 }
 0x28f   :  { %v917_v35 = vmul.f32 0.6931472, %v1236_v34 }
 0x291   :  { %v920_v39 = vsub.f32 %v890_v3, %v917_v35 }
 0x292   :  { %v1238_v40 = vpop.eup %1237  ;;  %861 = vadd.xlane.f32.xlu1 %v858_v36 }
 0x293   :  { %v919_v41 = vmul.f32 0.6931472, %v1238_v40  ;;  %v928_v42 = vsub.f32 %v920_v39, %v926_v38 }
 0x295   :  { %v930_v44 = vmul.f32 %v1224_v8, %v928_v42  ;;  %v921_v45 = vsub.f32 %v891_v6, %v919_v41 }
 0x297   :  { %932 = vadd.xlane.f32.xlu1 %v930_v44  ;;  %v929_v47 = vsub.f32 %v921_v45, %v927_v43 }
 0x299   :  { %v931_v48 = vmul.f32 %v1226_v9, %v929_v47 }
 0x29b   :  { %934 = vadd.xlane.f32.xlu1 %v931_v48 }
 0x2b8   :  { %v842_v50 = vpop.xlane.xlu0 %841 }
 0x2bc   :  { %v840_v49 = vpop.xlane.xlu1 %839 }
 0x2bd   :  { %1239 = vlog2.f32 %v840_v49 }
 0x2be   :  { %1241 = vlog2.f32 %v842_v50 }
 0x2bf   :  { %1243 = vrcp.f32 %v897_v24 }
 0x2c0   :  { %1245 = vrcp.f32 %v899_v26 }
 0x2c7   :  { %v1240_v20 = vpop.eup %1239 }
 0x2c8   :  { %v844_v46 = vmul.f32 0.6931472, %v1240_v20  ;;  %v1242_v52 = vpop.eup %1241 }
 0x2c9   :  { %v846_v53 = vmul.f32 0.6931472, %v1242_v52  ;;  %v1244_v63 = vpop.eup %1243 }
 0x2ca   :  { %v847_v54 = vadd.f32 %v844_v46, %v830_v14  ;;  %v1246_v5 = vpop.eup %1245 }
 0x2cb   :  { %v848_v58 = vadd.f32 %v846_v53, %v1449_v12 }
 0x31b   :  { %v860_v55 = vpop.xlane.xlu1 %859 }
 0x31c   :  { %v863_v23 = vsub.f32 %v847_v54, %v860_v55 }
 0x31e   :  { %v865_v60 = vmul.f32 %v1050_v57, %v863_v23 }
 0x31f   :  { %v862_v59 = vpop.xlane.xlu1 %861 }
 0x320   :  { %v864_v61 = vsub.f32 %v848_v58, %v862_v59  ;;  %v868_v1 = vsel %vm867_vm3, %v865_v60, 0.0 }
 0x322   :  { %v866_v62 = vmul.f32 0.0, %v864_v61 }
 0x324   :  { %v933_v0 = vpop.xlane.xlu1 %932  ;;  %v869_v2 = vsel %vm867_vm3, %v866_v62, 0.0 }
 0x325   :  { %v938_v3 = vmul.f32 %v1244_v63, %v933_v0  ;;  %v870_v4 = vadd.f32 %v869_v2, %v868_v1 }
 0x327   :  { %871 = vadd.xlane.f32.xlu1 %v870_v4  ;;  %v940_v7 = vmul.f32 %v1050_v57, %v938_v3 }
 0x328   :  { %v935_v6 = vpop.xlane.xlu1 %934 }
 0x329   :  { %v939_v8 = vmul.f32 %v1246_v5, %v935_v6  ;;  %v942_v10 = vsel %vm867_vm3, %v940_v7, 0.0 }
 0x32b   :  { %v941_v9 = vmul.f32 0.0, %v939_v8 }
 0x32d   :  { %v943_v11 = vsel %vm867_vm3, %v941_v9, 0.0 }
 0x32e   :  { %v944_v12 = vadd.f32 %v943_v11, %v942_v10 }
 0x330   :  { %945 = vadd.xlane.f32.xlu1 %v944_v12 }
 0x3b4   :  { %v872_v13 = vpop.xlane.xlu1 %871 }
 0x3b5   :  { %v873_v14 = vrot.slane %v872_v13, 4 }
 0x3b7   :  { %v874_v15 = vadd.f32 %v873_v14, %v872_v13 }
 0x3b9   :  { %v875_v16 = vrot.slane %v874_v15, 2 }
 0x3bb   :  { %v876_v17 = vadd.f32 %v875_v16, %v874_v15 }
 0x3bd   :  { %v946_v18 = vpop.xlane.xlu1 %945  ;;  %v877_v19 = vrot.slane %v876_v17, 1 }
 0x3be   :  { %v947_v21 = vrot.slane %v946_v18, 4 }
 0x3bf   :  { %v878_v22 = vadd.f32 %v877_v19, %v876_v17 }
 0x3c0   :  { %v948_v24 = vadd.f32 %v947_v21, %v946_v18 }
 0x3c1   :  { %1139 = vpush %v878_v22 }
 0x3c2   :  { %v949_v25 = vrot.slane %v948_v24, 2 }
 0x3c4   :  { %v950_v26 = vadd.f32 %v949_v25, %v948_v24 }
 0x3c6   :  { %v951_v27 = vrot.slane %v950_v26, 1 }
 0x3c8   :  { %v952_v28 = vadd.f32 %v951_v27, %v950_v26 }
 0x3ca   :  { %1141 = vpush %v952_v28 }
 0x3f2   :  { %s1140_s0 = spop %1139 }
 0x3f3   :  { %v958_v30 = vstv %s1140_s0 }
 0x3fb   :  { %s1142_s22 = spop %1141 }
 0x3fc   :  { %v956_v29 = vstv %s1142_s22 }
 0x3fd   :  { %v957_v31 = vsel %vm955_vm4, %v956_v29, 0.0 }
 0x3fe   :  { %v959_v32 = vsel %vm954_vm5, %v958_v30, %v957_v31 }
 0x3ff   :  { %960 = vst [vmem:[#allocation9] sm:$0xff] %v959_v32 }
 0x400   :  { %1324 = shalt.err (!%p1321_p0)
}
 0x401   :  { %s1325_s26 = scalar_lea.hbm %s1475_s6, 128 }
 0x402   :  { %p1326_p1 = scmp.ne.s32.totalorder %s1475_s6, %s1325_s26  ;;  %p1329_p2 = scmp.lt.u32.totalorder %s1325_s26, %s1475_s6 }
 0x404   :  { %p1331_p3 = pnand %p1329_p2, %p1326_p1 }
 0x406   :  { %1334 = shalt.err (!%p1331_p3)
}
 0x407   :  { %970 = dma.vmem_to_hbm [thread:$0]  %s968_s21, 128, %s1475_s6, [#allocation5]  }
 0x408   :  { %1339 = dma.done.wait [#allocation5], 128  }
 0x409   :  { %1340 = vsyncadd [#allocation5], 4294967168 }
 0x40a   :  { %974 = vsyncpa [#allocation4], 1 }
 0x40b   :  { %975 = vsyncpa [#allocation7], 1 }
 0x40c   :  { %976 = vsyncpa [#allocation5], 1 }

</bundles_post_ra>
